<compile_context>
chip_gen: v7x
topology: tpu7x:2x2x1
jax: 0.10.0
libtpu: 0.0.40
codegen_flags: <defaults>
</compile_context>

<pallas_src>
import functools

import jax
import jax.numpy as jnp
from jax import lax
from jax.experimental import pallas as pl
from jax.experimental.pallas import tpu as pltpu

NEG_SLOPE = 0.01  # F.leaky_relu default negative_slope
LANE = 128        # vreg lane width
SUBLANE = 8       # vreg sublane count (f32)


def _round_up(x, m):
    return ((x + m - 1) // m) * m


# ----------------------------- Pallas kernel ------------------------------ #
def _gcn_fused_kernel(adj_hbm, x_ref, w1_ref, b1_ref, w2_ref, b2_ref,
                      o_ref, adj_vmem, xw_ref, hw_ref, copy_sem, *, tm, nt):
    """Fused 2-layer GCN.

    adj_hbm  : [Np, Np] bf16  normalized adjacency in HBM (memory_space=pl.ANY)
    x_ref    : [Np, Fp] bf16  node features
    w1_ref   : [Fp, Hp] bf16,  b1_ref : [1, Hp] f32
    w2_ref   : [Hp, Hp] bf16,  b2_ref : [1, Hp] f32
    o_ref    : [tm, Hp] f32   row tile of the layer-2 output
    adj_vmem : [Np, Np] bf16  single resident VMEM copy of A_hat (scratch)
    xw_ref   : [Np, Hp] bf16  VMEM scratch: X @ W1
    hw_ref   : [Np, Hp] bf16  VMEM scratch: leaky_relu(A @ XW1 + b1) @ W2
    copy_sem : DMA semaphore for the adjacency copy
    """
    i = pl.program_id(0)

    # ---- Prologue (grid step 0 only): layer 1 + h1 @ W2, kept resident in VMEM ----
    @pl.when(i == 0)
    def _prologue():
        # Single resident adjacency copy: start the HBM -> VMEM DMA now ...
        adj_cp = pltpu.make_async_copy(adj_hbm, adj_vmem, copy_sem)
        adj_cp.start()

        # ... and overlap it with X @ W1 (row-tiled, bounded f32 temporaries).
        def xw_body(t, carry):
            r = pl.multiple_of(t * tm, tm)
            xw = jnp.dot(x_ref[pl.ds(r, tm), :], w1_ref[...],
                         preferred_element_type=jnp.float32)
            xw_ref[pl.ds(r, tm), :] = xw.astype(jnp.bfloat16)
            return carry
        lax.fori_loop(0, nt, xw_body, 0)

        adj_cp.wait()

        # Layer 1: A_hat @ (X W1) + b1, leaky_relu, then (.) @ W2 -> hw (row-tiled).
        def hw_body(t, carry):
            r = pl.multiple_of(t * tm, tm)
            h1 = jnp.dot(adj_vmem[pl.ds(r, tm), :], xw_ref[...],
                         preferred_element_type=jnp.float32)
            h1 = h1 + b1_ref[...]                          # bias (f32)
            h1 = jnp.where(h1 >= 0, h1, NEG_SLOPE * h1)    # leaky_relu (f32)
            hw = jnp.dot(h1.astype(jnp.bfloat16), w2_ref[...],
                         preferred_element_type=jnp.float32)
            hw_ref[pl.ds(r, tm), :] = hw.astype(jnp.bfloat16)
            return carry
        lax.fori_loop(0, nt, hw_body, 0)

    # ---- Per-row-tile layer-2 aggregation: A_hat[rows] @ (h1 W2) + b2 ----
    row0 = pl.multiple_of(i * tm, tm)
    a_rows = adj_vmem[pl.ds(row0, tm), :]                  # [tm, Np] bf16 (VMEM slice)
    h2 = jnp.dot(a_rows, hw_ref[...], preferred_element_type=jnp.float32)
    # Output kept f32 to match the torch module; cast here to bf16 if the caller
    # can accept it (halves writeback / output double-buffer).
    o_ref[...] = (h2 + b2_ref[...]).astype(o_ref.dtype)


# ------------------------------ JAX glue ---------------------------------- #
def normalized_adjacency(edge_index, edge_weight, num_nodes):
    """Dense D^{-1/2}(A + remaining self-loops)D^{-1/2}, matching gcn_norm."""
    src = edge_index[0]
    dst = edge_index[1]
    a = jnp.zeros((num_nodes, num_nodes), jnp.float32)
    a = a.at[dst, src].add(edge_weight)                      # messages flow src -> dst
    # add_remaining_self_loops: add fill_value=1.0 only for nodes WITHOUT a self-loop.
    has_self = (jnp.zeros((num_nodes,), jnp.float32)
                .at[src].add(jnp.where(src == dst, 1.0, 0.0)) > 0)
    a = a + jnp.diag(jnp.where(has_self, 0.0, 1.0))
    deg = a.sum(axis=1)                                      # weighted in-degree
    dis = jnp.where(deg > 0, 1.0 / jnp.sqrt(deg), 0.0)
    return dis[:, None] * a * dis[None, :]


def gcn_forward(x, edge_index, edge_weight, w1, b1, w2, b2, *, tm=512):
    """Fused 2-layer GCN forward (A_hat built in JAX, both convs in one Pallas call)."""
    n, f = x.shape
    h1dim = w1.shape[1]
    h2dim = w2.shape[1]

    adj = normalized_adjacency(edge_index, edge_weight, n)

    # Lane-dense padding: features / hidden -> multiple of 128 lanes; node dim ->
    # multiple of 128 (decoupled from tm).  Zero padding is exact: padded adjacency
    # rows/cols are zero, padded weight/bias entries are zero, so the valid
    # [:n, :h2dim] block of the result is unchanged.
    fp = _round_up(f, LANE)
    hp = _round_up(max(h1dim, h2dim), LANE)
    np_ = _round_up(n, LANE)

    # tm: a multiple of 128 (lane-dense output stores, >=16-row bf16 adjacency
    # slices) that exactly divides the padded node dim.
    tm = max(LANE, (min(tm, np_) // LANE) * LANE)
    while np_ % tm:
        tm -= LANE
    num_m = np_ // tm

    adj_p = jnp.zeros((np_, np_), jnp.float32).at[:n, :n].set(adj).astype(jnp.bfloat16)
    x_p = jnp.zeros((np_, fp), jnp.float32).at[:n, :f].set(x).astype(jnp.bfloat16)
    w1_p = jnp.zeros((fp, hp), jnp.float32).at[:f, :h1dim].set(w1).astype(jnp.bfloat16)
    w2_p = jnp.zeros((hp, hp), jnp.float32).at[:h1dim, :h2dim].set(w2).astype(jnp.bfloat16)
    b1_p = jnp.zeros((1, hp), jnp.float32).at[0, :h1dim].set(b1)
    b2_p = jnp.zeros((1, hp), jnp.float32).at[0, :h2dim].set(b2)

    flops = (2 * np_ * fp * hp          # X @ W1
             + 2 * np_ * np_ * hp       # A @ (X W1)
             + 2 * np_ * hp * hp        # h1 @ W2
             + 2 * np_ * np_ * hp)      # A @ (h1 W2)
    bytes_accessed = (adj_p.size * 2 + x_p.size * 2 + w1_p.size * 2 + w2_p.size * 2
                      + b1_p.size * 4 + b2_p.size * 4 + np_ * hp * 4)

    # VMEM budget computed from the actual resident buffers (not hard-coded).
    vmem_needed = (
        np_ * np_ * 2                     # adjacency: single resident VMEM copy
        + 2 * np_ * hp * 2                # xw + hw bf16 scratches
        + 2 * np_ * fp * 2                # X (pipelined input, up to 2 buffers)
        + 2 * fp * hp * 2                 # W1
        + 2 * hp * hp * 2                 # W2
        + 4 * hp * 4                      # biases
        + 2 * tm * hp * 4                 # output double buffer
        + 6 * tm * hp * 4                 # in-kernel f32 temporaries headroom
    )
    try:
        vmem_phys = int(pltpu.get_tpu_info().vmem_capacity_bytes)
    except Exception:
        vmem_phys = 64 * 1024 * 1024      # conservative (v7x per-TC) fallback
    vmem_limit = int(min(max(vmem_needed * 5 // 4, 16 * 1024 * 1024),
                         max(vmem_phys * 7 // 8, 16 * 1024 * 1024)))

    kernel = functools.partial(_gcn_fused_kernel, tm=tm, nt=num_m)

    out_p = pl.pallas_call(
        kernel,
        out_shape=jax.ShapeDtypeStruct((np_, hp), jnp.float32),
        grid=(num_m,),
        in_specs=[
            pl.BlockSpec(memory_space=pl.ANY),            # adjacency: raw HBM ref
            pl.BlockSpec((np_, fp), lambda i: (0, 0)),    # X
            pl.BlockSpec((fp, hp), lambda i: (0, 0)),     # W1
            pl.BlockSpec((1, hp), lambda i: (0, 0)),      # b1
            pl.BlockSpec((hp, hp), lambda i: (0, 0)),     # W2
            pl.BlockSpec((1, hp), lambda i: (0, 0)),      # b2
        ],
        out_specs=pl.BlockSpec((tm, hp), lambda i: (i, 0)),
        scratch_shapes=[
            pltpu.VMEM((np_, np_), jnp.bfloat16),         # A_hat, single VMEM copy
            pltpu.VMEM((np_, hp), jnp.bfloat16),          # X @ W1
            pltpu.VMEM((np_, hp), jnp.bfloat16),          # leaky(A@XW1 + b1) @ W2
            pltpu.SemaphoreType.DMA,                      # adjacency copy semaphore
        ],
        compiler_params=pltpu.CompilerParams(
            # Row-tile axis must be "arbitrary": step 0 fills the VMEM scratches that
            # later steps read (sequential dependence through scratch on one TC).
            dimension_semantics=("arbitrary",),
            vmem_limit_bytes=vmem_limit,
        ),
        cost_estimate=pl.CostEstimate(
            flops=flops, transcendentals=0, bytes_accessed=bytes_accessed),
    )(adj_p, x_p, w1_p, b1_p, w2_p, b2_p)

    return out_p[:n, :h2dim]


def gcn_reference(x, adj, w1, b1, w2, b2):
    """Pure-JAX f32 reference for a sanity check."""
    h = adj @ (x @ w1) + b1
    h = jnp.where(h >= 0, h, NEG_SLOPE * h)
    return adj @ (h @ w2) + b2


# -------------------------------- main ------------------------------------ #
if __name__ == "__main__":
    N, NFEAT, NHID = 200, 8, 32   # Np pads to 256 -> tm=128 gives a 2-step grid

    key = jax.random.PRNGKey(0)
    kx, kw, kw1, kb1, kw2, kb2 = jax.random.split(key, 6)

    # Node features.
    x = jax.random.normal(kx, (N, NFEAT), jnp.float32)

    # Simple bidirectional ring graph with positive edge weights.
    s = jnp.arange(N, dtype=jnp.int32)
    d = (s + 1) % N
    edge_index = jnp.stack(
        [jnp.concatenate([s, d]), jnp.concatenate([d, s])], axis=0
    )  # [2, 2N]
    edge_weight = jax.random.uniform(
        kw, (edge_index.shape[1],), jnp.float32, minval=0.5, maxval=1.5
    )

    # Deterministic parameter init (glorot-ish scale); shapes from GCNConv.
    w1 = jax.random.normal(kw1, (NFEAT, NHID), jnp.float32) * (1.0 / jnp.sqrt(NFEAT))
    b1 = jax.random.normal(kb1, (NHID,), jnp.float32) * 0.1
    w2 = jax.random.normal(kw2, (NHID, NHID), jnp.float32) * (1.0 / jnp.sqrt(NHID))
    b2 = jax.random.normal(kb2, (NHID,), jnp.float32) * 0.1

    # tm=128 (multiple of 128, divides Np=256) -> exercises a multi-step grid.
    out = gcn_forward(x, edge_index, edge_weight, w1, b1, w2, b2, tm=128)
    jax.block_until_ready(out)
    assert out.shape == (N, NHID)

    # Loose sanity check vs. f32 reference (kernel uses bf16 MXU operands).
    adj = normalized_adjacency(edge_index, edge_weight, N)
    ref = gcn_reference(x, adj, w1, b1, w2, b2)
    max_err = float(jnp.max(jnp.abs(out - ref)))
    assert max_err < 1e-1, f"max abs error too large: {max_err}"

    print("KERNEL_OK")
</pallas_src>

<mosaic_0001>
module attributes {stable_mosaic.version = 11 : i64} {
  func.func @_gcn_fused_kernel(%arg0: i32, %arg1: memref<256x256xbf16, #tpu.memory_space<any>>, %arg2: memref<256x128xbf16, #tpu.memory_space<vmem>>, %arg3: memref<128x128xbf16, #tpu.memory_space<vmem>>, %arg4: memref<1x128xf32, #tpu.memory_space<vmem>>, %arg5: memref<128x128xbf16, #tpu.memory_space<vmem>>, %arg6: memref<1x128xf32, #tpu.memory_space<vmem>>, %arg7: memref<128x128xf32, #tpu.memory_space<vmem>>, %arg8: memref<256x256xbf16, #tpu.memory_space<vmem>>, %arg9: memref<256x128xbf16, #tpu.memory_space<vmem>>, %arg10: memref<256x128xbf16, #tpu.memory_space<vmem>>, %arg11: memref<!tpu.dma_semaphore, #tpu.memory_space<semaphore_mem>>) attributes {dimension_semantics = [#tpu.dimension_semantics<arbitrary>], iteration_bounds = array<i64: 2>, scalar_prefetch = 0 : i64, scratch_operands = 4 : i64, tpu.core_type = #tpu.core_type<tc>, window_params = [{}, {pipeline_mode = #tpu.pipeline_mode<synchronous>, transform_indices = @transform_1, window_bounds = array<i64: 256, 128>}, {pipeline_mode = #tpu.pipeline_mode<synchronous>, transform_indices = @transform_2, window_bounds = array<i64: 128, 128>}, {pipeline_mode = #tpu.pipeline_mode<synchronous>, transform_indices = @transform_3, window_bounds = array<i64: 1, 128>}, {pipeline_mode = #tpu.pipeline_mode<synchronous>, transform_indices = @transform_4, window_bounds = array<i64: 128, 128>}, {pipeline_mode = #tpu.pipeline_mode<synchronous>, transform_indices = @transform_5, window_bounds = array<i64: 1, 128>}, {transform_indices = @transform_6, window_bounds = array<i64: 128, 128>}]} {
    %c0_i32 = arith.constant 0 : i32
    %0 = arith.cmpi eq, %arg0, %c0_i32 : i32
    %1 = arith.extui %0 : i1 to i32
    %c0_i32_0 = arith.constant 0 : i32
    %2 = arith.cmpi ne, %1, %c0_i32_0 : i32
    scf.if %2 {
      tpu.enqueue_dma source(%arg1 : memref<256x256xbf16, #tpu.memory_space<any>>) target(%arg8 : memref<256x256xbf16, #tpu.memory_space<vmem>>) target_semaphore(%arg11 : memref<!tpu.dma_semaphore, #tpu.memory_space<semaphore_mem>>)
      %c0_i32_7 = arith.constant 0 : i32
      %c2_i32 = arith.constant 2 : i32
      %13 = arith.addi %c0_i32_7, %c2_i32 : i32
      %c1_i32 = arith.constant 1 : i32
      scf.for %arg12 = %c0_i32_7 to %13 step %c1_i32  : i32 {
        %c128_i32_13 = arith.constant 128 : i32
        %15 = arith.muli %arg12, %c128_i32_13 : i32
        %16 = tpu.assume_multiple %15, 128 : i32
        %17 = arith.index_cast %16 : i32 to index
        %c0_14 = arith.constant 0 : index
        %18 = vector.load %arg2[%17, %c0_14] : memref<256x128xbf16, #tpu.memory_space<vmem>>, vector<128x128xbf16>
        %c0_15 = arith.constant 0 : index
        %c0_16 = arith.constant 0 : index
        %19 = vector.load %arg3[%c0_15, %c0_16] : memref<128x128xbf16, #tpu.memory_space<vmem>>, vector<128x128xbf16>
        %cst_17 = arith.constant dense<0.000000e+00> : vector<128x128xf32>
        %20 = tpu.matmul %18, %19, %cst_17 {dimension_numbers = #tpu.dot_dimension_numbers<[1], [0], [0], [1], [0, 0, 1, 1], [], []>} : vector<128x128xbf16>, vector<128x128xbf16>, vector<128x128xf32> -> vector<128x128xf32>
        %21 = arith.truncf %20 : vector<128x128xf32> to vector<128x128xbf16>
        %22 = arith.index_cast %16 : i32 to index
        %c0_18 = arith.constant 0 : index
        %23 = vector.load %arg9[%22, %c0_18] : memref<256x128xbf16, #tpu.memory_space<vmem>>, vector<128x128xbf16>
        tpu.vector_store %arg9[%22, %c0_18], %21 {strides = array<i32>} : memref<256x128xbf16, #tpu.memory_space<vmem>>, vector<128x128xbf16>,
      }
      %c2_i32_8 = arith.constant 2 : i32
      tpu.wait_dma2 semaphore(%arg11 : memref<!tpu.dma_semaphore, #tpu.memory_space<semaphore_mem>>) src(%arg1 : memref<256x256xbf16, #tpu.memory_space<any>>) dst(%arg8 : memref<256x256xbf16, #tpu.memory_space<vmem>>)
      %c0_i32_9 = arith.constant 0 : i32
      %c2_i32_10 = arith.constant 2 : i32
      %14 = arith.addi %c0_i32_9, %c2_i32_10 : i32
      %c1_i32_11 = arith.constant 1 : i32
      scf.for %arg12 = %c0_i32_9 to %14 step %c1_i32_11  : i32 {
        %c128_i32_13 = arith.constant 128 : i32
        %15 = arith.muli %arg12, %c128_i32_13 : i32
        %16 = tpu.assume_multiple %15, 128 : i32
        %17 = arith.index_cast %16 : i32 to index
        %c0_14 = arith.constant 0 : index
        %18 = vector.load %arg8[%17, %c0_14] : memref<256x256xbf16, #tpu.memory_space<vmem>>, vector<128x256xbf16>
        %c0_15 = arith.constant 0 : index
        %c0_16 = arith.constant 0 : index
        %19 = vector.load %arg9[%c0_15, %c0_16] : memref<256x128xbf16, #tpu.memory_space<vmem>>, vector<256x128xbf16>
        %cst_17 = arith.constant dense<0.000000e+00> : vector<128x128xf32>
        %20 = tpu.matmul %18, %19, %cst_17 {dimension_numbers = #tpu.dot_dimension_numbers<[1], [0], [0], [1], [0, 0, 1, 1], [], []>} : vector<128x256xbf16>, vector<256x128xbf16>, vector<128x128xf32> -> vector<128x128xf32>
        %c0_18 = arith.constant 0 : index
        %c0_19 = arith.constant 0 : index
        %21 = vector.load %arg4[%c0_18, %c0_19] : memref<1x128xf32, #tpu.memory_space<vmem>>, vector<1x128xf32>
        %22 = vector.broadcast %21 : vector<1x128xf32> to vector<128x128xf32>
        %23 = arith.addf %20, %22 : vector<128x128xf32>
        %cst_20 = arith.constant 0.000000e+00 : f32
        %24 = vector.broadcast %cst_20 : f32 to vector<128x128xf32>
        %25 = arith.cmpf oge, %23, %24 : vector<128x128xf32>
        %cst_21 = arith.constant 0.00999999977 : f32
        %26 = vector.broadcast %cst_21 : f32 to vector<128x128xf32>
        %27 = arith.mulf %26, %23 : vector<128x128xf32>
        %28 = arith.select %25, %23, %27 : vector<128x128xi1>, vector<128x128xf32>
        %29 = arith.truncf %28 : vector<128x128xf32> to vector<128x128xbf16>
        %c0_22 = arith.constant 0 : index
        %c0_23 = arith.constant 0 : index
        %30 = vector.load %arg5[%c0_22, %c0_23] : memref<128x128xbf16, #tpu.memory_space<vmem>>, vector<128x128xbf16>
        %cst_24 = arith.constant dense<0.000000e+00> : vector<128x128xf32>
        %31 = tpu.matmul %29, %30, %cst_24 {dimension_numbers = #tpu.dot_dimension_numbers<[1], [0], [0], [1], [0, 0, 1, 1], [], []>} : vector<128x128xbf16>, vector<128x128xbf16>, vector<128x128xf32> -> vector<128x128xf32>
        %32 = arith.truncf %31 : vector<128x128xf32> to vector<128x128xbf16>
        %33 = arith.index_cast %16 : i32 to index
        %c0_25 = arith.constant 0 : index
        %34 = vector.load %arg10[%33, %c0_25] : memref<256x128xbf16, #tpu.memory_space<vmem>>, vector<128x128xbf16>
        tpu.vector_store %arg10[%33, %c0_25], %32 {strides = array<i32>} : memref<256x128xbf16, #tpu.memory_space<vmem>>, vector<128x128xbf16>,
      }
      %c2_i32_12 = arith.constant 2 : i32
    } else {
    }
    %c128_i32 = arith.constant 128 : i32
    %3 = arith.muli %arg0, %c128_i32 : i32
    %4 = tpu.assume_multiple %3, 128 : i32
    %5 = arith.index_cast %4 : i32 to index
    %c0 = arith.constant 0 : index
    %6 = vector.load %arg8[%5, %c0] : memref<256x256xbf16, #tpu.memory_space<vmem>>, vector<128x256xbf16>
    %c0_1 = arith.constant 0 : index
    %c0_2 = arith.constant 0 : index
    %7 = vector.load %arg10[%c0_1, %c0_2] : memref<256x128xbf16, #tpu.memory_space<vmem>>, vector<256x128xbf16>
    %cst = arith.constant dense<0.000000e+00> : vector<128x128xf32>
    %8 = tpu.matmul %6, %7, %cst {dimension_numbers = #tpu.dot_dimension_numbers<[1], [0], [0], [1], [0, 0, 1, 1], [], []>} : vector<128x256xbf16>, vector<256x128xbf16>, vector<128x128xf32> -> vector<128x128xf32>
    %c0_3 = arith.constant 0 : index
    %c0_4 = arith.constant 0 : index
    %9 = vector.load %arg6[%c0_3, %c0_4] : memref<1x128xf32, #tpu.memory_space<vmem>>, vector<1x128xf32>
    %10 = vector.broadcast %9 : vector<1x128xf32> to vector<128x128xf32>
    %11 = arith.addf %8, %10 : vector<128x128xf32>
    %c0_5 = arith.constant 0 : index
    %c0_6 = arith.constant 0 : index
    %12 = vector.load %arg7[%c0_5, %c0_6] : memref<128x128xf32, #tpu.memory_space<vmem>>, vector<128x128xf32>
    tpu.vector_store %arg7[%c0_5, %c0_6], %11 {strides = array<i32>} : memref<128x128xf32, #tpu.memory_space<vmem>>, vector<128x128xf32>,
    return
  }
  func.func @transform_1(%arg0: i32) -> (i32, i32) {
    %c0_i32 = arith.constant 0 : i32
    %c0_i32_0 = arith.constant 0 : i32
    %c0_i32_1 = arith.constant 0 : i32
    return %c0_i32, %c0_i32_0 : i32, i32
  }
  func.func @transform_2(%arg0: i32) -> (i32, i32) {
    %c0_i32 = arith.constant 0 : i32
    %c0_i32_0 = arith.constant 0 : i32
    %c0_i32_1 = arith.constant 0 : i32
    return %c0_i32, %c0_i32_0 : i32, i32
  }
  func.func @transform_3(%arg0: i32) -> (i32, i32) {
    %c0_i32 = arith.constant 0 : i32
    %c0_i32_0 = arith.constant 0 : i32
    %c0_i32_1 = arith.constant 0 : i32
    return %c0_i32, %c0_i32_0 : i32, i32
  }
  func.func @transform_4(%arg0: i32) -> (i32, i32) {
    %c0_i32 = arith.constant 0 : i32
    %c0_i32_0 = arith.constant 0 : i32
    %c0_i32_1 = arith.constant 0 : i32
    return %c0_i32, %c0_i32_0 : i32, i32
  }
  func.func @transform_5(%arg0: i32) -> (i32, i32) {
    %c0_i32 = arith.constant 0 : i32
    %c0_i32_0 = arith.constant 0 : i32
    %c0_i32_1 = arith.constant 0 : i32
    return %c0_i32, %c0_i32_0 : i32, i32
  }
  func.func @transform_6(%arg0: i32) -> (i32, i32) {
    %c0_i32 = arith.constant 0 : i32
    %c0_i32_0 = arith.constant 0 : i32
    return %arg0, %c0_i32 : i32, i32
  }
}

</mosaic_0001>

<bundles_post_ra>
// kernel: tpu_custom_call.1
= control target key start
LH: loop header
LB: loop body
LE: loop exit
PB: predicated region body
PF: predicated region fallthrough
CT: control target
= control target key end

     0   :  { %11 = vsyncpa [#allocation7], 0  ;;  %s2223_s0 = inlined_call_operand.hbm [shape: bf16[256,256], index: 0, kind: input, shape index: {}]   ;;  %s2224_s1 = inlined_call_operand.hbm [shape: bf16[256,128], index: 1, kind: input, shape index: {}]   ;;  %s2225_s2 = inlined_call_operand.hbm [shape: bf16[128,128], index: 2, kind: input, shape index: {}]   ;;  %s2226_s3 = inlined_call_operand.vmem [shape: f32[1,128], index: 3, kind: input, shape index: {}]   ;;  %s2227_s4 = inlined_call_operand.hbm [shape: bf16[128,128], index: 4, kind: input, shape index: {}]   ;;  %s2228_s5 = inlined_call_operand.vmem [shape: f32[1,128], index: 5, kind: input, shape index: {}]   ;;  %s2229_s6 = inlined_call_operand.hbm [shape: f32[256,128], index: 6, kind: output, shape index: {}]  }
   0x1   :  { %12 = vsyncpa [#allocation10], 0 }
   0x2   :  { %13 = vsyncpa [#allocation8], 0 }
   0x3   :  { %15 = vsyncpa [#allocation8 + $0x1], 0  ;;  %s1872_s21 = smov 0   ;;  %s1874_s22 = smov 0  }
   0x4   :  { %s1876_s23 = smov 0   ;;  %s1878_s24 = smov 0  }
   0x5 LB: > { %2234 = sst [smem:[#allocation19_spill]] %s1807_s23  ;;  %s1893_s25 = sadd.s32 4294967295, %s1811_s24   ;;  %s1811_s24 = sphi %s1878_s24, %s2253_s24   ;;  %s1807_s23 = sphi %s1876_s23, %s2250_s23   ;;  %s1803_s22 = sphi %s1874_s22, %s2252_s22   ;;  %s1799_s21 = sphi %s1872_s21, %s2251_s21  }
   0x6   : > { %s1211_s26 = sadd.s32 4294967294, %s1811_s24   ;;  %s1897_s27 = sadd.s32 1, %s1811_s24  }
   0x7   : > { %s133_s28 = sadd.s32 1, %s1807_s23  ;;  %s130_s29 = ssub.s32 %s1811_s24, %s1897_s27 }
   0x8   : > { %p143_p0 = scmp.ne.s32.totalorder %s1807_s23, %s1803_s22  ;;  %p131_p1 = scmp.eq.s32.totalorder %s130_s29, 0 }
   0x9   : > { %p144_p2 = scmp.eq.s32.totalorder %s1893_s25, 1  ;;  %p149_p3 = scmp.ne.s32.totalorder %s1803_s22, %s1799_s21 }
   0xa   : > { %p150_p4 = scmp.eq.s32.totalorder %s1211_s26, 1  ;;  %p1212_p7 = scmp.ge.s32.totalorder %s1811_s24, 1 }
   0xb   : > { %s1908_s30 = scalar_select %p131_p1, %s1807_s23, %s133_s28  }
   0xc   : > { %p1910_p5 = por %p144_p2, %p143_p0  ;;  %p1914_p6 = por %p150_p4, %p149_p3 }
   0xd   : > { %2235 = sst [smem:[#allocation20_spill]] %s1908_s30  ;;  %p157_p8 = scmp.lt.s32.totalorder %s1811_s24, 3 }
   0xe   : > { %s2236_s7 = scalar_select %p1910_p5, 1, 0 }
   0xf   : > { %s2237_s8 = scalar_select %p1914_p6, 1, 0 }
  0x10   : > { %p2230_p10 = scmp.eq.s32.totalorder %s1893_s25, 0  ;;  %p1922_p11 = pnand %p1212_p7, %p157_p8 }
  0x11   : > { %s1821_s10 = smov [#allocation9]   ;;  %s1822_s13 = smov [#allocation6]  }
  0x12   : > { %s2238_s9 = scalar_select %p1922_p11, 1, 0 }
  0x13   : > { %p1539_p12 = pneg %p1922_p11  ;;  %s182_s11 = sshll.u32 %s1821_s10, 4  ;;  %s1928_s11 = int_to_ptr.vmem [resolvable:$true] %s182_s11 }
  0x14   : > { %s169_s14 = sshll.u32 %s1822_s13, 4  ;;  %s1823_s15 = smov [#allocation11]   ;;  %s1936_s14 = int_to_ptr.vmem [resolvable:$true] %s169_s14 }
  0x15   : > { %p1932_p13 = pnand %p2230_p10, %p1539_p12  ;;  %s1938_s16 = sshll.u32 %s1823_s15, 4  ;;  %s199_s16 = int_to_ptr.vmem [resolvable:$true] %s1938_s16 }
  0x16   : > { %s1647_s19 = scalar_lea.hbm %s2225_s2, 1024 }
  0x17   : > { %p1648_p0 = scmp.ne.s32.totalorder %s2225_s2, %s1647_s19  ;;  %p1948_p1 = pneg %p1932_p13 }
  0x18   : > { %p1654_p4 = scmp.lt.u32.totalorder %s1647_s19, %s2225_s2 }
  0x19   : > { %p1650_p2 = pnand %p1948_p1, %p1648_p0 }
  0x1b   : > { %p1651_p3 = pneg %p1650_p2 }
  0x1d   : > { %p1656_p7 = pnand %p1654_p4, %p1651_p3 }
  0x1f   : > { %1659 = shalt.err (!%p1656_p7)
}
  0x20   : > { %s1660_s13 = scalar_lea.vmem %s1928_s11, 1024  ;;  %p1668_p10 = scmp.lt.s32.totalorder %s1928_s11, %s1928_s11 }
  0x21   : > { %p1661_p8 = scmp.ne.s32.totalorder %s1928_s11, %s1660_s13  ;;  %p1669_p6 = scmp.lt.s32.totalorder %s1660_s13, %s1660_s13 }
  0x23   : > { %p1663_p12 = pnand %p1661_p8, %p1948_p1  ;;  %p1670_p0 = por %p1669_p6, %p1668_p10 }
  0x25   : > { %p1664_p9 = pneg %p1663_p12 }
  0x27   : > { %p1671_p2 = pnand %p1670_p0, %p1664_p9 }
  0x29   : > { %1674 = shalt.err (!%p1671_p2)
}
  0x2a   : > { %s1824_s15 = smov 64   ;;  %s1825_s17 = smov 4  }
  0x2b   : > { %1545 = dma.hbm_to_vmem [thread:$0]  (!%p1932_p13), %s2225_s2, 1024, %s1928_s11, [#allocation10], %s1824_s15, %s1824_s15, %s1825_s17  }
  0x2c   : > { %s1675_s29 = scalar_lea.hbm %s2224_s1, 2048 }
  0x2d   : > { %p1676_p6 = scmp.ne.s32.totalorder %s2224_s1, %s1675_s29  ;;  %p1682_p3 = scmp.lt.u32.totalorder %s1675_s29, %s2224_s1 }
  0x2f   : > { %p1678_p9 = pnand %p1676_p6, %p1948_p1 }
  0x31   : > { %p1679_p10 = pneg %p1678_p9 }
  0x33   : > { %p1684_p4 = pnand %p1682_p3, %p1679_p10 }
  0x35   : > { %1687 = shalt.err (!%p1684_p4)
}
  0x36   : > { %s1688_s11 = scalar_lea.vmem %s1936_s14, 2048  ;;  %p1696_p0 = scmp.lt.s32.totalorder %s1936_s14, %s1936_s14 }
  0x37   : > { %p1689_p7 = scmp.ne.s32.totalorder %s1936_s14, %s1688_s11  ;;  %p1697_p2 = scmp.lt.s32.totalorder %s1688_s11, %s1688_s11 }
  0x39   : > { %p1691_p8 = pnand %p1689_p7, %p1948_p1  ;;  %p1698_p6 = por %p1697_p2, %p1696_p0 }
  0x3b   : > { %p1692_p12 = pneg %p1691_p8 }
  0x3d   : > { %p1699_p9 = pnand %p1698_p6, %p1692_p12 }
  0x3f   : > { %1702 = shalt.err (!%p1699_p9)
}
  0x40   : > { %1542 = dma.hbm_to_vmem [thread:$0]  (!%p1932_p13), %s2224_s1, 2048, %s1936_s14, [#allocation7], %s1824_s15, %s1824_s15, %s1825_s17  }
  0x41   : > { %s1703_s20 = scalar_lea.hbm %s2227_s4, 1024 }
  0x42   : > { %p1704_p10 = scmp.ne.s32.totalorder %s2227_s4, %s1703_s20  ;;  %p1710_p7 = scmp.lt.u32.totalorder %s1703_s20, %s2227_s4 }
  0x44   : > { %p1706_p3 = pnand %p1704_p10, %p1948_p1 }
  0x46   : > { %p1707_p4 = pneg %p1706_p3 }
  0x48   : > { %p1712_p8 = pnand %p1710_p7, %p1707_p4 }
  0x4a   : > { %1715 = shalt.err (!%p1712_p8)
}
  0x4b   : > { %s1716_s11 = scalar_lea.vmem %s199_s16, 1024  ;;  %p1724_p6 = scmp.lt.s32.totalorder %s199_s16, %s199_s16 }
  0x4c   : > { %p1717_p12 = scmp.ne.s32.totalorder %s199_s16, %s1716_s11  ;;  %p1725_p9 = scmp.lt.s32.totalorder %s1716_s11, %s1716_s11 }
  0x4e   : > { %p1719_p0 = pnand %p1717_p12, %p1948_p1  ;;  %p1726_p5 = por %p1725_p9, %p1724_p6 }
  0x50   : > { %p1720_p2 = pneg %p1719_p0 }
  0x52   : > { %p1727_p11 = pnand %p1726_p5, %p1720_p2 }
  0x54   : > { %1730 = shalt.err (!%p1727_p11)
}
  0x55   : > { %1548 = dma.hbm_to_vmem [thread:$0]  (!%p1932_p13), %s2227_s4, 1024, %s199_s16, [#allocation10], %s1824_s15, %s1824_s15, %s1825_s17  }
  0x56   : > { %p2241_p10 = scmp.ne.s32.totalorder %s2238_s9, 0 }
  0x57   : > { %p2242_p1 = scmp.eq.s32.totalorder (!%p2241_p10), %s1893_s25, 0 }
  0x58   : > { %217 = sbr.rel (%p2241_p10) target bundleno = 1213 (0x4bd), region = 40 }
  0x5f   : > { %1784 = dma.done.wait (%p2242_p1), [#allocation7], 2048   ;;  %p2243_p3 = pmov %p2242_p1 }
  0x60   : > { %p2244_p5 = pmov %p2242_p1 }
  0x61   : > { %1786 = vsyncadd (%p2243_p3), [#allocation7], 4294965248 }
  0x62   : > { %1788 = dma.done.wait (%p2244_p5), [#allocation10], 2048   ;;  %p2245_p11 = pmov %p2242_p1 }
  0x63   : > { %s245_s12 = sand.u32 1, %s1803_s22   ;;  %p2246_p13 = scmp.ne.s32.totalorder %s1893_s25, 0 }
  0x64   : > { %1790 = vsyncadd (%p2245_p11), [#allocation10], 4294965248  ;;  %s1220_s16 = sshll.u32 %s245_s12, 7 }
  0x65   : > { %s2033_s28 = scalar_lea.vmem [#allocation12], %s1220_s16  ;;  %253 = sbr.rel (%p2246_p13) target bundleno = 916 (0x394), region = 56 }
  0x6c   : > { %s258_s9 = sld [smem:[#allocation0]]   ;;  %s1826_s15 = smov [#allocation2]  }
  0x6d   : > { %s266_s17 = sshll.u32 %s1826_s15, 4  ;;  %s1827_s30 = smov 256   ;;  %s267_s17 = int_to_ptr.vmem [resolvable:$true] %s266_s17 }
  0x6e   : > { %270 = sst [smem:[#allocation14]] %s1827_s30  ;;  %s1828_s18 = smov 2  }
  0x6f   : > { %272 = sst [smem:[#allocation14 + $0x1]] %s1827_s30  ;;  %s1829_s19 = smov 64  }
  0x70   : > { %274 = sst [smem:[#allocation14 + $0x2]] %s1828_s18  ;;  %s1830_s26 = smov 128  }
  0x71   : > { %276 = sst [smem:[#allocation14 + $0x3]] %s1829_s19  ;;  %s1831_s10 = smov 4  }
  0x72   : > { %s1222_s20 = sshll.u32 %s258_s9, 26  ;;  %278 = sst [smem:[#allocation14 + $0x4]] %s1830_s26 }
  0x73   : > { %s1223_s29 = sadd.s32 134217728, %s1222_s20  ;;  %280 = sst [smem:[#allocation14 + $0x5]] %s1828_s18 }
  0x74   : > { %282 = sst [smem:[#allocation14 + $0x6]] %s1830_s26  ;;  %s1832_s13 = smov [#allocation5]  }
  0x75   : > { %284 = sst [smem:[#allocation14 + $0x7]] %s1829_s19  ;;  %s1833_s11 = smov [#allocation13]  }
  0x76   : > { %286 = sst [smem:[#allocation14 + $0x8]] %s1831_s10  ;;  %s2040_s16 = smov 0  }
  0x77   : > { %288 = dma.general %s2223_s0, 4096, %s267_s17, %s1832_s13, %s1833_s11, [#allocation14], %s1223_s29, 0  }
  0x78 LB: >> { %v1623_v0 = vld [vmem:[#allocation9] sm:$0xff]   ;;  %v1624_v1 = vld [vmem:[#allocation9 + $0x8] sm:$0xff]   ;;  %s1224_s9 = sshll.u32 %s1815_s16, 7  ;;  %v1625_v2 = vld [vmem:[#allocation9 + $0x10] sm:$0xff]   ;;  %s294_s16 = sadd.s32 1, %s1815_s16   ;;  %s1815_s16 = sphi %s2040_s16, %s294_s16  }
  0x79   : >> { %1429 = vmatprep.subr.bf16.mxu0 %v1623_v0  ;;  %1493 = vmatprep.subr.bf16.mxu1 %v1623_v0  ;;  %s296_s15 = sshra.s32 %s1224_s9, 3  ;;  %v1626_v3 = vld [vmem:[#allocation9 + $0x18] sm:$0xff]   ;;  %v1627_v6 = vld [vmem:[#allocation9 + $0x20] sm:$0xff]   ;;  %v1628_v7 = vld [vmem:[#allocation9 + $0x28] sm:$0xff]   ;;  %s533_s18 = sshra.s32 %s1224_s9, 4 }
  0x7a   : >> { %1430 = vmatpush3.bf16.msra.mxu0 %v1623_v0  ;;  %1501 = vmatpush3.bf16.msra.mxu1 %v1623_v0  ;;  %s1225_s17 = sshll.u32 %s296_s15, 2  ;;  %v1629_v8 = vld [vmem:[#allocation9 + $0x30] sm:$0xff]   ;;  %v1630_v9 = vld [vmem:[#allocation9 + $0x38] sm:$0xff]   ;;  %s1242_s19 = sshll.u32 %s533_s18, 3 }
  0x7b   : >> { %1431 = vmatprep.subr.bf16.mxu0 %v1624_v1  ;;  %1494 = vmatprep.subr.bf16.mxu1 %v1624_v1  ;;  %s2048_s30 = scalar_lea.vmem [#allocation6], %s1225_s17  ;;  %s536_s20 = scalar_lea.vmem [#allocation3], %s1242_s19 }
  0x7c   : >> { %v1631_v4 = vld [vmem:[%s2048_s30] sm:$0xff]   ;;  %v1633_v10 = vld [vmem:[%s2048_s30 + $0x8] sm:$0xff]   ;;  %v1635_v12 = vld [vmem:[%s2048_s30 + $0x10] sm:$0xff]   ;;  %p291_p4 = scmp.ge.s32.totalorder %s294_s16, 2  }
  0x7d   : >> { %v1632_v5 = vld [vmem:[%s2048_s30 + $0x20] sm:$0xff]   ;;  %1445 = vmatprep.mubr.bf16.mxu0 %v1631_v4  ;;  %v1634_v11 = vld [vmem:[%s2048_s30 + $0x28] sm:$0xff]   ;;  %v1636_v13 = vld [vmem:[%s2048_s30 + $0x30] sm:$0xff]  }
  0x7e   : >> { %1432 = vmatpush3.bf16.msra.mxu0 %v1624_v1  ;;  %1502 = vmatpush3.bf16.msra.mxu1 %v1624_v1  ;;  %v1637_v14 = vld [vmem:[%s2048_s30 + $0x18] sm:$0xff]  }
  0x7f   : >> { %1433 = vmatprep.subr.bf16.mxu0 %v1625_v2  ;;  %1495 = vmatprep.subr.bf16.mxu1 %v1625_v2  ;;  %v1638_v15 = vld [vmem:[%s2048_s30 + $0x38] sm:$0xff]  }
  0x80   : >> { %1453 = vmatprep.mubr.bf16.mxu1 %v1632_v5 }
  0x82   : >> { %1434 = vmatpush3.bf16.msra.mxu0 %v1625_v2  ;;  %1503 = vmatpush3.bf16.msra.mxu1 %v1625_v2 }
  0x83   : >> { %1435 = vmatprep.subr.bf16.mxu0 %v1626_v3  ;;  %1496 = vmatprep.subr.bf16.mxu1 %v1626_v3 }
  0x86   : >> { %1436 = vmatpush3.bf16.msra.mxu0 %v1626_v3  ;;  %1504 = vmatpush3.bf16.msra.mxu1 %v1626_v3 }
  0x87   : >> { %1437 = vmatprep.subr.bf16.mxu0 %v1627_v6  ;;  %1497 = vmatprep.subr.bf16.mxu1 %v1627_v6 }
  0x8a   : >> { %1438 = vmatpush3.bf16.msra.mxu0 %v1627_v6  ;;  %1505 = vmatpush3.bf16.msra.mxu1 %v1627_v6 }
  0x8b   : >> { %1439 = vmatprep.subr.bf16.mxu0 %v1628_v7  ;;  %1498 = vmatprep.subr.bf16.mxu1 %v1628_v7 }
  0x8e   : >> { %1440 = vmatpush3.bf16.msra.mxu0 %v1628_v7  ;;  %1506 = vmatpush3.bf16.msra.mxu1 %v1628_v7 }
  0x8f   : >> { %1441 = vmatprep.subr.bf16.mxu0 %v1629_v8  ;;  %1499 = vmatprep.subr.bf16.mxu1 %v1629_v8 }
  0x92   : >> { %1442 = vmatpush3.bf16.msra.mxu0 %v1629_v8  ;;  %1507 = vmatpush3.bf16.msra.mxu1 %v1629_v8 }
  0x93   : >> { %1443 = vmatprep.subr.bf16.mxu0 %v1630_v9  ;;  %1500 = vmatprep.subr.bf16.mxu1 %v1630_v9 }
  0x96   : >> { %1444 = vmatpush3.bf16.msra.mxu0 %v1630_v9  ;;  %1508 = vmatpush3.bf16.msra.mxu1 %v1630_v9 }
  0x99   : >> { %1446 = vmatmul.mubr.bf16.vlgmr.msra.gmra.mrb[0].mxu0 %v1633_v10  ;;  %1454 = vmatmul.mubr.bf16.vlgmr.msra.gmra.mrb[0].mxu1 %v1634_v11 }
  0x9a   : >> { %1449 = vmatprep.mubr.bf16.mxu0 %v1635_v12  ;;  %1457 = vmatprep.mubr.bf16.mxu1 %v1636_v13 }
  0xa1   : >> { %1450 = vmatmul.mubr.bf16.gmra.mrb[4].mxu0 %v1637_v14  ;;  %1458 = vmatmul.mubr.bf16.gmra.mrb[4].mxu1 %v1638_v15 }
 0x16c   : >> { %v1447_v16 = vpop.f32.mrb[0].mxu0  ;;  %v1455_v17 = vpop.f32.mrb[0].mxu1 }
 0x16d   : >> { %v462_v18 = vpop.f32.mrb[1].mxu0  ;;  %v494_v19 = vpop.f32.mrb[1].mxu1 }
 0x16e   : >> { %v1448_v20 = vpop.f32.mrb[2].mxu0  ;;  %v1456_v21 = vpop.f32.mrb[2].mxu1 }
 0x16f   : >> { %v526_v22 = vpack.c.bf16 %v1448_v20, %v1447_v16  ;;  %v530_v23 = vpack.c.bf16 %v1456_v21, %v1455_v17  ;;  %v465_v24 = vpop.f32.mrb[3].mxu0  ;;  %v497_v25 = vpop.f32.mrb[3].mxu1 }
 0x170   : >> { %v525_v26 = vpack.c.bf16 %v465_v24, %v462_v18  ;;  %v529_v27 = vpack.c.bf16 %v497_v25, %v494_v19 }
 0x171   : >> { %538 = vst [vmem:[%s536_s20 + $0x8] sm:$0xff] %v526_v22  ;;  %542 = vst [vmem:[%s536_s20 + $0x28] sm:$0xff] %v530_v23 }
 0x172   : >> { %537 = vst [vmem:[%s536_s20] sm:$0xff] %v525_v26  ;;  %541 = vst [vmem:[%s536_s20 + $0x20] sm:$0xff] %v529_v27 }
 0x174   : >> { %v1451_v28 = vpop.f32.mrb[4].mxu0  ;;  %v1459_v29 = vpop.f32.mrb[4].mxu1  ;;  %293 = sbr.rel (!%p291_p4) target bundleno = 120 (0x78), region = 116 }
 0x175   : >> { %v478_v30 = vpop.f32.mrb[5].mxu0  ;;  %v510_v31 = vpop.f32.mrb[5].mxu1 }
 0x176   : >> { %v1452_v32 = vpop.f32.mrb[6].mxu0  ;;  %v1460_v33 = vpop.f32.mrb[6].mxu1 }
 0x177   : >> { %v528_v34 = vpack.c.bf16 %v1452_v32, %v1451_v28  ;;  %v532_v35 = vpack.c.bf16 %v1460_v33, %v1459_v29  ;;  %v481_v36 = vpop.f32.mrb[7].mxu0  ;;  %v513_v37 = vpop.f32.mrb[7].mxu1 }
 0x178   : >> { %v527_v38 = vpack.c.bf16 %v481_v36, %v478_v30  ;;  %v531_v39 = vpack.c.bf16 %v513_v37, %v510_v31 }
 0x179   : >> { %540 = vst [vmem:[%s536_s20 + $0x18] sm:$0xff] %v528_v34  ;;  %544 = vst [vmem:[%s536_s20 + $0x38] sm:$0xff] %v532_v35 }
 0x17a   : >> { %539 = vst [vmem:[%s536_s20 + $0x10] sm:$0xff] %v527_v38  ;;  %543 = vst [vmem:[%s536_s20 + $0x30] sm:$0xff] %v531_v39 }
 0x17b   : > { %1791 = dma.done.wait [#allocation5], 4096 }
 0x17c   : > { %1792 = vsyncadd [#allocation5], 4294963200  ;;  %s2063_s26 = smov 0  }
 0x17d LB: >> { %s1243_s29 = sshll.u32 %s1819_s26, 7  ;;  %v1639_v50 = vld [vmem:[#allocation11] sm:$0xff]   ;;  %v1640_v51 = vld [vmem:[#allocation11 + $0x8] sm:$0xff]   ;;  %v1641_v53 = vld [vmem:[#allocation11 + $0x10] sm:$0xff]   ;;  %s554_s26 = sadd.s32 1, %s1819_s26   ;;  %s1819_s26 = sphi %s2063_s26, %s554_s26  }
 0x17e   : >> { %s2071_s10 = scalar_lea.vmem [#allocation2], %s1243_s29  ;;  %1461 = vmatprep.subr.bf16.mxu1 %v1639_v50  ;;  %v1642_v11 = vld [vmem:[#allocation11 + $0x18] sm:$0xff]   ;;  %v1643_v12 = vld [vmem:[#allocation11 + $0x20] sm:$0xff]   ;;  %v1644_v13 = vld [vmem:[#allocation11 + $0x28] sm:$0xff]   ;;  %s556_s14 = sshra.s32 %s1243_s29, 4 }
 0x17f   : >> { %v562_v45 = vld [vmem:[%s2071_s10 + $0x8] sm:$0xff]  ;;  %1462 = vmatpush3.bf16.msra.mxu1 %v1639_v50  ;;  %v561_v60 = vld [vmem:[%s2071_s10] sm:$0xff]  ;;  %v564_v61 = vld [vmem:[%s2071_s10 + $0x18] sm:$0xff]  ;;  %s1255_s23 = sshll.u32 %s556_s14, 3  ;;  %p551_p7 = scmp.ge.s32.totalorder %s554_s26, 2  }
 0x180   : >> { %632 = vmatprep.mubr.bf16.mxu0 %v562_v45  ;;  %1463 = vmatprep.subr.bf16.mxu1 %v1640_v51  ;;  %v563_v62 = vld [vmem:[%s2071_s10 + $0x10] sm:$0xff]  ;;  %v566_v63 = vld [vmem:[%s2071_s10 + $0x28] sm:$0xff]  ;;  %v565_v0 = vld [vmem:[%s2071_s10 + $0x20] sm:$0xff]  ;;  %s923_s16 = scalar_lea.vmem [#allocation4], %s1255_s23 }
 0x181   : >> { %v585_v40 = vld [vmem:[#allocation3 + $0x40] sm:$0xff]  ;;  %v586_v42 = vld [vmem:[#allocation3 + $0x48] sm:$0xff]  ;;  %v587_v44 = vld [vmem:[#allocation3 + $0x50] sm:$0xff] }
 0x182   : >> { %v577_v41 = vld [vmem:[#allocation3] sm:$0xff]  ;;  %1285 = vmatprep.subr.bf16.mxu0 %v585_v40  ;;  %v578_v43 = vld [vmem:[#allocation3 + $0x8] sm:$0xff]  ;;  %v579_v46 = vld [vmem:[#allocation3 + $0x10] sm:$0xff] }
 0x183   : >> { %1286 = vmatpush3.bf16.msra.mxu0 %v577_v41  ;;  %v588_v47 = vld [vmem:[#allocation3 + $0x58] sm:$0xff]  ;;  %v589_v49 = vld [vmem:[#allocation3 + $0x60] sm:$0xff]  ;;  %v590_v54 = vld [vmem:[#allocation3 + $0x68] sm:$0xff]  ;;  %1464 = vmatpush3.bf16.msra.mxu1 %v1640_v51 }
 0x184   : >> { %1287 = vmatprep.subr.bf16.mxu0 %v586_v42  ;;  %v580_v48 = vld [vmem:[#allocation3 + $0x18] sm:$0xff]  ;;  %v581_v52 = vld [vmem:[#allocation3 + $0x20] sm:$0xff]  ;;  %v582_v55 = vld [vmem:[#allocation3 + $0x28] sm:$0xff]  ;;  %1465 = vmatprep.subr.bf16.mxu1 %v1641_v53 }
 0x185   : >> { %v591_v56 = vld [vmem:[#allocation3 + $0x70] sm:$0xff]  ;;  %v592_v58 = vld [vmem:[#allocation3 + $0x78] sm:$0xff]  ;;  %v570_v3 = vld [vmem:[%s2071_s10 + $0x48] sm:$0xff] }
 0x186   : >> { %v583_v57 = vld [vmem:[#allocation3 + $0x30] sm:$0xff]  ;;  %v584_v59 = vld [vmem:[#allocation3 + $0x38] sm:$0xff]  ;;  %v569_v4 = vld [vmem:[%s2071_s10 + $0x40] sm:$0xff] }
 0x187   : >> { %1288 = vmatpush3.bf16.msra.mxu0 %v578_v43  ;;  %1466 = vmatpush3.bf16.msra.mxu1 %v1641_v53  ;;  %v568_v1 = vld [vmem:[%s2071_s10 + $0x38] sm:$0xff]  ;;  %v567_v2 = vld [vmem:[%s2071_s10 + $0x30] sm:$0xff]  ;;  %v574_v7 = vld [vmem:[%s2071_s10 + $0x68] sm:$0xff] }
 0x188   : >> { %1289 = vmatprep.subr.bf16.mxu0 %v587_v44  ;;  %v572_v5 = vld [vmem:[%s2071_s10 + $0x58] sm:$0xff]  ;;  %v571_v6 = vld [vmem:[%s2071_s10 + $0x50] sm:$0xff]  ;;  %v573_v8 = vld [vmem:[%s2071_s10 + $0x60] sm:$0xff]  ;;  %1467 = vmatprep.subr.bf16.mxu1 %v1642_v11 }
 0x189   : >> { %v576_v9 = vld [vmem:[%s2071_s10 + $0x78] sm:$0xff]  ;;  %v575_v10 = vld [vmem:[%s2071_s10 + $0x70] sm:$0xff]  ;;  %v2092_v17 = vld [vmem:[%s2226_s3] ss:$0 sm:$0xff] }
 0x18a   : >> { %v1645_v14 = vld [vmem:[#allocation11 + $0x30] sm:$0xff]   ;;  %v1646_v15 = vld [vmem:[#allocation11 + $0x38] sm:$0xff]  }
 0x18b   : >> { %1290 = vmatpush3.bf16.msra.mxu0 %v579_v46  ;;  %1468 = vmatpush3.bf16.msra.mxu1 %v1642_v11 }
 0x18c   : >> { %1291 = vmatprep.subr.bf16.mxu0 %v588_v47  ;;  %1469 = vmatprep.subr.bf16.mxu1 %v1643_v12 }
 0x18f   : >> { %1292 = vmatpush3.bf16.msra.mxu0 %v580_v48  ;;  %1470 = vmatpush3.bf16.msra.mxu1 %v1643_v12 }
 0x190   : >> { %1293 = vmatprep.subr.bf16.mxu0 %v589_v49  ;;  %1471 = vmatprep.subr.bf16.mxu1 %v1644_v13 }
 0x193   : >> { %1294 = vmatpush3.bf16.msra.mxu0 %v581_v52  ;;  %1472 = vmatpush3.bf16.msra.mxu1 %v1644_v13 }
 0x194   : >> { %1295 = vmatprep.subr.bf16.mxu0 %v590_v54  ;;  %1473 = vmatprep.subr.bf16.mxu1 %v1645_v14 }
 0x197   : >> { %1296 = vmatpush3.bf16.msra.mxu0 %v582_v55  ;;  %1474 = vmatpush3.bf16.msra.mxu1 %v1645_v14 }
 0x198   : >> { %1297 = vmatprep.subr.bf16.mxu0 %v591_v56  ;;  %1475 = vmatprep.subr.bf16.mxu1 %v1646_v15 }
 0x19b   : >> { %1298 = vmatpush3.bf16.msra.mxu0 %v583_v57  ;;  %1476 = vmatpush3.bf16.msra.mxu1 %v1646_v15 }
 0x19c   : >> { %1299 = vmatprep.subr.bf16.mxu0 %v592_v58 }
 0x19f   : >> { %1300 = vmatpush3.bf16.msra.mxu0 %v584_v59 }
 0x1a2   : >> { %633 = vmatmul.mubr.bf16.vlgmr.msra.gmra.mrb[0].mxu0 %v561_v60 }
 0x1a3   : >> { %640 = vmatprep.mubr.bf16.mxu0 %v564_v61 }
 0x1aa   : >> { %641 = vmatmul.mubr.bf16.gmra.mrb[4].mxu0 %v563_v62 }
 0x1ab   : >> { %648 = vmatprep.mubr.bf16.mxu0 %v566_v63 }
 0x1b2   : >> { %649 = vmatmul.mubr.bf16.gmra.mrb[8].mxu0 %v565_v0 }
 0x1b3   : >> { %656 = vmatprep.mubr.bf16.mxu0 %v568_v1 }
 0x1ba   : >> { %657 = vmatmul.mubr.bf16.gmra.mrb[12].mxu0 %v567_v2 }
 0x1bb   : >> { %664 = vmatprep.mubr.bf16.mxu0 %v570_v3 }
 0x1c2   : >> { %665 = vmatmul.mubr.bf16.gmra.mrb[16].mxu0 %v569_v4 }
 0x1c3   : >> { %672 = vmatprep.mubr.bf16.mxu0 %v572_v5 }
 0x1ca   : >> { %673 = vmatmul.mubr.bf16.gmra.mrb[20].mxu0 %v571_v6 }
 0x1cb   : >> { %680 = vmatprep.mubr.bf16.mxu0 %v574_v7 }
 0x1d2   : >> { %681 = vmatmul.mubr.bf16.gmra.mrb[24].mxu0 %v573_v8 }
 0x1d3   : >> { %688 = vmatprep.mubr.bf16.mxu0 %v576_v9 }
 0x1da   : >> { %689 = vmatmul.mubr.bf16.gmra.mrb[28].mxu0 %v575_v10 }
 0x275   : >> { %v1301_v16 = vpop.f32.mrb[0].mxu0 }
 0x276   : >> { %v1302_v18 = vpop.f32.mrb[1].mxu0 }
 0x277   : >> { %v1303_v19 = vadd.f32 %v1302_v18, %v1301_v16  ;;  %v1304_v20 = vpop.f32.mrb[2].mxu0 }
 0x278   : >> { %v1305_v21 = vpop.f32.mrb[3].mxu0 }
 0x279   : >> { %v635_v22 = vadd.f32 %v1303_v19, %v2092_v17  ;;  %v1306_v23 = vadd.f32 %v1305_v21, %v1304_v20 }
 0x27b   : >> { %v638_v24 = vadd.f32 %v1306_v23, %v2092_v17  ;;  %v713_v25 = vmul.f32 0.01, %v635_v22  ;;  %vm697_vm0 = vcmp.ge.f32.partialorder %v635_v22, 0.0 }
 0x27d   : >> { %v1307_v26 = vpop.f32.mrb[4].mxu0  ;;  %vm698_vm1 = vcmp.ge.f32.partialorder %v638_v24, 0.0  ;;  %v714_v27 = vmul.f32 0.01, %v638_v24  ;;  %v729_v31 = vsel %vm697_vm0, %v635_v22, %v713_v25 }
 0x27e   : >> { %v1308_v28 = vpop.f32.mrb[5].mxu0 }
 0x27f   : >> { %v1309_v29 = vadd.f32 %v1308_v28, %v1307_v26  ;;  %v1310_v30 = vpop.f32.mrb[6].mxu0  ;;  %v730_v32 = vsel %vm698_vm1, %v638_v24, %v714_v27 }
 0x280   : >> { %v1311_v33 = vpop.f32.mrb[7].mxu0  ;;  %v745_v34 = vpack.c.bf16 %v730_v32, %v729_v31 }
 0x281   : >> { %v643_v35 = vadd.f32 %v1309_v29, %v2092_v17  ;;  %v1312_v36 = vadd.f32 %v1311_v33, %v1310_v30 }
 0x282   : >> { %1477 = vmatprep.mubr.bf16.mxu1 %v745_v34 }
 0x283   : >> { %v715_v37 = vmul.f32 0.01, %v643_v35  ;;  %v646_v38 = vadd.f32 %v1312_v36, %v2092_v17  ;;  %vm699_vm2 = vcmp.ge.f32.partialorder %v643_v35, 0.0 }
 0x285   : >> { %vm700_vm3 = vcmp.ge.f32.partialorder %v646_v38, 0.0  ;;  %v716_v39 = vmul.f32 0.01, %v646_v38  ;;  %v1313_v40 = vpop.f32.mrb[8].mxu0  ;;  %v731_v44 = vsel %vm699_vm2, %v643_v35, %v715_v37 }
 0x286   : >> { %v1314_v41 = vpop.f32.mrb[9].mxu0 }
 0x287   : >> { %v1315_v42 = vadd.f32 %v1314_v41, %v1313_v40  ;;  %v1316_v43 = vpop.f32.mrb[10].mxu0  ;;  %v732_v45 = vsel %vm700_vm3, %v646_v38, %v716_v39 }
 0x288   : >> { %v1317_v46 = vpop.f32.mrb[11].mxu0  ;;  %v746_v47 = vpack.c.bf16 %v732_v45, %v731_v44 }
 0x289   : >> { %v651_v48 = vadd.f32 %v1315_v42, %v2092_v17  ;;  %v1318_v49 = vadd.f32 %v1317_v46, %v1316_v43 }
 0x28a   : >> { %1478 = vmatmul.mubr.bf16.vlgmr.msra.gmra.mrb[0].mxu1 %v746_v47 }
 0x28b   : >> { %v717_v50 = vmul.f32 0.01, %v651_v48  ;;  %v654_v51 = vadd.f32 %v1318_v49, %v2092_v17  ;;  %vm701_vm4 = vcmp.ge.f32.partialorder %v651_v48, 0.0 }
 0x28d   : >> { %vm702_vm5 = vcmp.ge.f32.partialorder %v654_v51, 0.0  ;;  %v718_v52 = vmul.f32 0.01, %v654_v51  ;;  %v1319_v53 = vpop.f32.mrb[12].mxu0  ;;  %v733_v57 = vsel %vm701_vm4, %v651_v48, %v717_v50 }
 0x28e   : >> { %v1320_v54 = vpop.f32.mrb[13].mxu0 }
 0x28f   : >> { %v1321_v55 = vadd.f32 %v1320_v54, %v1319_v53  ;;  %v1322_v56 = vpop.f32.mrb[14].mxu0  ;;  %v734_v58 = vsel %vm702_vm5, %v654_v51, %v718_v52 }
 0x290   : >> { %v1323_v59 = vpop.f32.mrb[15].mxu0  ;;  %v747_v60 = vpack.c.bf16 %v734_v58, %v733_v57 }
 0x291   : >> { %v659_v61 = vadd.f32 %v1321_v55, %v2092_v17  ;;  %v1324_v62 = vadd.f32 %v1323_v59, %v1322_v56 }
 0x292   : >> { %1481 = vmatprep.mubr.bf16.mxu1 %v747_v60 }
 0x293   : >> { %v719_v63 = vmul.f32 0.01, %v659_v61  ;;  %v662_v0 = vadd.f32 %v1324_v62, %v2092_v17  ;;  %vm703_vm6 = vcmp.ge.f32.partialorder %v659_v61, 0.0 }
 0x295   : >> { %vm704_vm7 = vcmp.ge.f32.partialorder %v662_v0, 0.0  ;;  %v720_v1 = vmul.f32 0.01, %v662_v0  ;;  %v1325_v2 = vpop.f32.mrb[16].mxu0  ;;  %v735_v6 = vsel %vm703_vm6, %v659_v61, %v719_v63 }
 0x296   : >> { %v1326_v3 = vpop.f32.mrb[17].mxu0 }
 0x297   : >> { %v1327_v4 = vadd.f32 %v1326_v3, %v1325_v2  ;;  %v1328_v5 = vpop.f32.mrb[18].mxu0  ;;  %v736_v7 = vsel %vm704_vm7, %v662_v0, %v720_v1 }
 0x298   : >> { %v1329_v8 = vpop.f32.mrb[19].mxu0  ;;  %v748_v9 = vpack.c.bf16 %v736_v7, %v735_v6 }
 0x299   : >> { %v667_v10 = vadd.f32 %v1327_v4, %v2092_v17  ;;  %v1330_v11 = vadd.f32 %v1329_v8, %v1328_v5 }
 0x29a   : >> { %1482 = vmatmul.mubr.bf16.gmra.mrb[4].mxu1 %v748_v9 }
 0x29b   : >> { %v721_v12 = vmul.f32 0.01, %v667_v10  ;;  %v670_v13 = vadd.f32 %v1330_v11, %v2092_v17  ;;  %vm705_vm8 = vcmp.ge.f32.partialorder %v667_v10, 0.0 }
 0x29d   : >> { %vm706_vm9 = vcmp.ge.f32.partialorder %v670_v13, 0.0  ;;  %v722_v14 = vmul.f32 0.01, %v670_v13  ;;  %v1331_v15 = vpop.f32.mrb[20].mxu0  ;;  %v737_v20 = vsel %vm705_vm8, %v667_v10, %v721_v12 }
 0x29e   : >> { %v1332_v16 = vpop.f32.mrb[21].mxu0 }
 0x29f   : >> { %v1333_v18 = vadd.f32 %v1332_v16, %v1331_v15  ;;  %v1334_v19 = vpop.f32.mrb[22].mxu0  ;;  %v738_v21 = vsel %vm706_vm9, %v670_v13, %v722_v14 }
 0x2a0   : >> { %v1335_v22 = vpop.f32.mrb[23].mxu0  ;;  %v749_v23 = vpack.c.bf16 %v738_v21, %v737_v20 }
 0x2a1   : >> { %v675_v24 = vadd.f32 %v1333_v18, %v2092_v17  ;;  %v1336_v25 = vadd.f32 %v1335_v22, %v1334_v19 }
 0x2a2   : >> { %1485 = vmatprep.mubr.bf16.mxu1 %v749_v23 }
 0x2a3   : >> { %v723_v26 = vmul.f32 0.01, %v675_v24  ;;  %v678_v27 = vadd.f32 %v1336_v25, %v2092_v17  ;;  %vm707_vm10 = vcmp.ge.f32.partialorder %v675_v24, 0.0 }
 0x2a5   : >> { %vm708_vm11 = vcmp.ge.f32.partialorder %v678_v27, 0.0  ;;  %v724_v28 = vmul.f32 0.01, %v678_v27  ;;  %v1337_v29 = vpop.f32.mrb[24].mxu0  ;;  %v739_v33 = vsel %vm707_vm10, %v675_v24, %v723_v26 }
 0x2a6   : >> { %v1338_v30 = vpop.f32.mrb[25].mxu0 }
 0x2a7   : >> { %v1339_v31 = vadd.f32 %v1338_v30, %v1337_v29  ;;  %v1340_v32 = vpop.f32.mrb[26].mxu0  ;;  %v740_v34 = vsel %vm708_vm11, %v678_v27, %v724_v28 }
 0x2a8   : >> { %v1341_v35 = vpop.f32.mrb[27].mxu0  ;;  %v750_v36 = vpack.c.bf16 %v740_v34, %v739_v33 }
 0x2a9   : >> { %v683_v37 = vadd.f32 %v1339_v31, %v2092_v17  ;;  %v1342_v38 = vadd.f32 %v1341_v35, %v1340_v32 }
 0x2aa   : >> { %1486 = vmatmul.mubr.bf16.gmra.mrb[8].mxu1 %v750_v36 }
 0x2ab   : >> { %v725_v39 = vmul.f32 0.01, %v683_v37  ;;  %v686_v40 = vadd.f32 %v1342_v38, %v2092_v17  ;;  %vm709_vm12 = vcmp.ge.f32.partialorder %v683_v37, 0.0 }
 0x2ad   : >> { %vm710_vm13 = vcmp.ge.f32.partialorder %v686_v40, 0.0  ;;  %v726_v41 = vmul.f32 0.01, %v686_v40  ;;  %v1343_v42 = vpop.f32.mrb[28].mxu0  ;;  %v741_v46 = vsel %vm709_vm12, %v683_v37, %v725_v39 }
 0x2ae   : >> { %v1344_v43 = vpop.f32.mrb[29].mxu0 }
 0x2af   : >> { %v1345_v44 = vadd.f32 %v1344_v43, %v1343_v42  ;;  %v1346_v45 = vpop.f32.mrb[30].mxu0  ;;  %v742_v47 = vsel %vm710_vm13, %v686_v40, %v726_v41 }
 0x2b0   : >> { %v1347_v48 = vpop.f32.mrb[31].mxu0  ;;  %v751_v49 = vpack.c.bf16 %v742_v47, %v741_v46 }
 0x2b1   : >> { %v691_v50 = vadd.f32 %v1345_v44, %v2092_v17  ;;  %v1348_v51 = vadd.f32 %v1347_v48, %v1346_v45 }
 0x2b2   : >> { %1489 = vmatprep.mubr.bf16.mxu1 %v751_v49 }
 0x2b3   : >> { %v727_v52 = vmul.f32 0.01, %v691_v50  ;;  %v694_v53 = vadd.f32 %v1348_v51, %v2092_v17  ;;  %vm711_vm14 = vcmp.ge.f32.partialorder %v691_v50, 0.0 }
 0x2b5   : >> { %vm712_vm15 = vcmp.ge.f32.partialorder %v694_v53, 0.0  ;;  %v728_v54 = vmul.f32 0.01, %v694_v53  ;;  %v743_v55 = vsel %vm711_vm14, %v691_v50, %v727_v52 }
 0x2b7   : >> { %v744_v56 = vsel %vm712_vm15, %v694_v53, %v728_v54 }
 0x2b8   : >> { %v752_v57 = vpack.c.bf16 %v744_v56, %v743_v55 }
 0x2ba   : >> { %1490 = vmatmul.mubr.bf16.gmra.mrb[12].mxu1 %v752_v57 }
 0x35d   : >> { %v1479_v58 = vpop.f32.mrb[0].mxu1 }
 0x35e   : >> { %v851_v59 = vpop.f32.mrb[1].mxu1 }
 0x35f   : >> { %v1480_v60 = vpop.f32.mrb[2].mxu1 }
 0x360   : >> { %v915_v61 = vpack.c.bf16 %v1480_v60, %v1479_v58  ;;  %v854_v62 = vpop.f32.mrb[3].mxu1 }
 0x361   : >> { %v914_v63 = vpack.c.bf16 %v854_v62, %v851_v59 }
 0x362   : >> { %925 = vst [vmem:[%s923_s16 + $0x8] sm:$0xff] %v915_v61 }
 0x363   : >> { %924 = vst [vmem:[%s923_s16] sm:$0xff] %v914_v63 }
 0x36d   : >> { %v1483_v17 = vpop.f32.mrb[4].mxu1 }
 0x36e   : >> { %v867_v0 = vpop.f32.mrb[5].mxu1 }
 0x36f   : >> { %v1484_v1 = vpop.f32.mrb[6].mxu1 }
 0x370   : >> { %v917_v2 = vpack.c.bf16 %v1484_v1, %v1483_v17  ;;  %v870_v3 = vpop.f32.mrb[7].mxu1 }
 0x371   : >> { %v916_v4 = vpack.c.bf16 %v870_v3, %v867_v0 }
 0x372   : >> { %927 = vst [vmem:[%s923_s16 + $0x18] sm:$0xff] %v917_v2 }
 0x373   : >> { %926 = vst [vmem:[%s923_s16 + $0x10] sm:$0xff] %v916_v4 }
 0x37d   : >> { %v1487_v5 = vpop.f32.mrb[8].mxu1 }
 0x37e   : >> { %v883_v6 = vpop.f32.mrb[9].mxu1 }
 0x37f   : >> { %v1488_v7 = vpop.f32.mrb[10].mxu1 }
 0x380   : >> { %v919_v8 = vpack.c.bf16 %v1488_v7, %v1487_v5  ;;  %v886_v9 = vpop.f32.mrb[11].mxu1 }
 0x381   : >> { %v918_v10 = vpack.c.bf16 %v886_v9, %v883_v6 }
 0x382   : >> { %929 = vst [vmem:[%s923_s16 + $0x28] sm:$0xff] %v919_v8 }
 0x383   : >> { %928 = vst [vmem:[%s923_s16 + $0x20] sm:$0xff] %v918_v10 }
 0x38d   : >> { %v1491_v11 = vpop.f32.mrb[12].mxu1  ;;  %553 = sbr.rel (!%p551_p7) target bundleno = 381 (0x17d), region = 127 }
 0x38e   : >> { %v899_v12 = vpop.f32.mrb[13].mxu1 }
 0x38f   : >> { %v1492_v13 = vpop.f32.mrb[14].mxu1 }
 0x390   : >> { %v921_v14 = vpack.c.bf16 %v1492_v13, %v1491_v11  ;;  %v902_v15 = vpop.f32.mrb[15].mxu1 }
 0x391   : >> { %v920_v16 = vpack.c.bf16 %v902_v15, %v899_v12 }
 0x392   : >> { %931 = vst [vmem:[%s923_s16 + $0x38] sm:$0xff] %v921_v14 }
 0x393   : >> { %930 = vst [vmem:[%s923_s16 + $0x30] sm:$0xff] %v920_v16 }
 0x394 PF: > { %s1256_s9 = sshll.u32 %s1893_s25, 7  ;;  %v2137_v52 = vld [vmem:[%s2228_s5] ss:$0 sm:$0xff]  ;;  %s1268_s18 = sshll.u32 %s1893_s25, 11 }
 0x395   : > { %s2116_s15 = scalar_lea.vmem [#allocation2], %s1256_s9  ;;  %s1104_s19 = sshll.u32 %s2033_s28, 4  ;;  %s2172_s19 = int_to_ptr.vmem [resolvable:$true] %s1104_s19 }
 0x396   : > { %v939_v23 = vld [vmem:[%s2116_s15 + $0x8] sm:$0xff]  ;;  %v938_v36 = vld [vmem:[%s2116_s15] sm:$0xff]  ;;  %v941_v38 = vld [vmem:[%s2116_s15 + $0x18] sm:$0xff]  ;;  %s2170_s29 = scalar_lea.hbm %s2229_s6, %s1268_s18  ;;  %s2182_s25 = scalar_lea.sflag [#allocation8], %s245_s12 }
 0x397   : > { %v947_v24 = vld [vmem:[%s2116_s15 + $0x48] sm:$0xff]  ;;  %1009 = vmatprep.mubr.bf16.mxu0 %v939_v23  ;;  %v946_v37 = vld [vmem:[%s2116_s15 + $0x40] sm:$0xff]  ;;  %v949_v39 = vld [vmem:[%s2116_s15 + $0x58] sm:$0xff]  ;;  %s1731_s10 = scalar_lea.vmem %s2172_s19, 2048  ;;  %p2247_p12 = scmp.ne.s32.totalorder %s2236_s7, 0 }
 0x398   : > { %1041 = vmatprep.mubr.bf16.mxu1 %v947_v24  ;;  %v940_v40 = vld [vmem:[%s2116_s15 + $0x10] sm:$0xff]  ;;  %v943_v42 = vld [vmem:[%s2116_s15 + $0x28] sm:$0xff]  ;;  %v942_v44 = vld [vmem:[%s2116_s15 + $0x20] sm:$0xff]  ;;  %p1732_p8 = scmp.ne.s32.totalorder %s2172_s19, %s1731_s10  ;;  %s1834_s13 = smov [#allocation12]  }
 0x399   : > { %v948_v41 = vld [vmem:[%s2116_s15 + $0x50] sm:$0xff]  ;;  %v951_v43 = vld [vmem:[%s2116_s15 + $0x68] sm:$0xff]  ;;  %v950_v45 = vld [vmem:[%s2116_s15 + $0x60] sm:$0xff]  ;;  %s1735_s11 = sshll.u32 %s1834_s13, 4  ;;  %s1736_s11 = int_to_ptr.vmem [resolvable:$false] %s1735_s11 }
 0x39a   : > { %v962_v18 = vld [vmem:[#allocation4 + $0x40] sm:$0xff]  ;;  %v963_v20 = vld [vmem:[#allocation4 + $0x48] sm:$0xff]  ;;  %v964_v22 = vld [vmem:[#allocation4 + $0x50] sm:$0xff]  ;;  %p1733_p0 = pnand %p1732_p8, %p2247_p12  ;;  %s1737_s14 = scalar_lea.vmem %s1736_s11, 4096 }
 0x39b   : > { %v954_v19 = vld [vmem:[#allocation4] sm:$0xff]  ;;  %1365 = vmatprep.subr.bf16.mxu0 %v962_v18  ;;  %1509 = vmatprep.subr.bf16.mxu1 %v962_v18  ;;  %v955_v21 = vld [vmem:[#allocation4 + $0x8] sm:$0xff]  ;;  %v956_v25 = vld [vmem:[#allocation4 + $0x10] sm:$0xff]  ;;  %p1738_p6 = scmp.lt.s32.totalorder %s2172_s19, %s1736_s11  ;;  %p1739_p9 = scmp.lt.s32.totalorder %s1737_s14, %s1731_s10 }
 0x39c   : > { %1366 = vmatpush3.bf16.msra.mxu0 %v954_v19  ;;  %1517 = vmatpush3.bf16.msra.mxu1 %v954_v19  ;;  %v965_v26 = vld [vmem:[#allocation4 + $0x58] sm:$0xff]  ;;  %v966_v28 = vld [vmem:[#allocation4 + $0x60] sm:$0xff]  ;;  %v967_v30 = vld [vmem:[#allocation4 + $0x68] sm:$0xff]  ;;  %p1734_p2 = pneg %p1733_p0 }
 0x39d   : > { %1367 = vmatprep.subr.bf16.mxu0 %v963_v20  ;;  %1510 = vmatprep.subr.bf16.mxu1 %v963_v20  ;;  %v957_v27 = vld [vmem:[#allocation4 + $0x18] sm:$0xff]  ;;  %v958_v29 = vld [vmem:[#allocation4 + $0x20] sm:$0xff]  ;;  %v959_v31 = vld [vmem:[#allocation4 + $0x28] sm:$0xff]  ;;  %p1740_p10 = por %p1739_p9, %p1738_p6 }
 0x39e   : > { %v968_v32 = vld [vmem:[#allocation4 + $0x70] sm:$0xff]  ;;  %v969_v34 = vld [vmem:[#allocation4 + $0x78] sm:$0xff] }
 0x39f   : > { %v960_v33 = vld [vmem:[#allocation4 + $0x30] sm:$0xff]  ;;  %v961_v35 = vld [vmem:[#allocation4 + $0x38] sm:$0xff]  ;;  %p1741_p1 = pnand %p1740_p10, %p1734_p2 }
 0x3a0   : > { %1368 = vmatpush3.bf16.msra.mxu0 %v955_v21  ;;  %1518 = vmatpush3.bf16.msra.mxu1 %v955_v21  ;;  %v945_v46 = vld [vmem:[%s2116_s15 + $0x38] sm:$0xff]  ;;  %v944_v48 = vld [vmem:[%s2116_s15 + $0x30] sm:$0xff] }
 0x3a1   : > { %1369 = vmatprep.subr.bf16.mxu0 %v964_v22  ;;  %1511 = vmatprep.subr.bf16.mxu1 %v964_v22  ;;  %v953_v47 = vld [vmem:[%s2116_s15 + $0x78] sm:$0xff]  ;;  %v952_v49 = vld [vmem:[%s2116_s15 + $0x70] sm:$0xff] }
 0x3a4   : > { %1370 = vmatpush3.bf16.msra.mxu0 %v956_v25  ;;  %1519 = vmatpush3.bf16.msra.mxu1 %v956_v25 }
 0x3a5   : > { %1371 = vmatprep.subr.bf16.mxu0 %v965_v26  ;;  %1512 = vmatprep.subr.bf16.mxu1 %v965_v26 }
 0x3a8   : > { %1372 = vmatpush3.bf16.msra.mxu0 %v957_v27  ;;  %1520 = vmatpush3.bf16.msra.mxu1 %v957_v27 }
 0x3a9   : > { %1373 = vmatprep.subr.bf16.mxu0 %v966_v28  ;;  %1513 = vmatprep.subr.bf16.mxu1 %v966_v28 }
 0x3ac   : > { %1374 = vmatpush3.bf16.msra.mxu0 %v958_v29  ;;  %1521 = vmatpush3.bf16.msra.mxu1 %v958_v29 }
 0x3ad   : > { %1375 = vmatprep.subr.bf16.mxu0 %v967_v30  ;;  %1514 = vmatprep.subr.bf16.mxu1 %v967_v30 }
 0x3b0   : > { %1376 = vmatpush3.bf16.msra.mxu0 %v959_v31  ;;  %1522 = vmatpush3.bf16.msra.mxu1 %v959_v31 }
 0x3b1   : > { %1377 = vmatprep.subr.bf16.mxu0 %v968_v32  ;;  %1515 = vmatprep.subr.bf16.mxu1 %v968_v32 }
 0x3b4   : > { %1378 = vmatpush3.bf16.msra.mxu0 %v960_v33  ;;  %1523 = vmatpush3.bf16.msra.mxu1 %v960_v33 }
 0x3b5   : > { %1379 = vmatprep.subr.bf16.mxu0 %v969_v34  ;;  %1516 = vmatprep.subr.bf16.mxu1 %v969_v34 }
 0x3b8   : > { %1380 = vmatpush3.bf16.msra.mxu0 %v961_v35  ;;  %1524 = vmatpush3.bf16.msra.mxu1 %v961_v35 }
 0x3bb   : > { %1010 = vmatmul.mubr.bf16.vlgmr.msra.gmra.mrb[0].mxu0 %v938_v36  ;;  %1042 = vmatmul.mubr.bf16.vlgmr.msra.gmra.mrb[0].mxu1 %v946_v37 }
 0x3bc   : > { %1017 = vmatprep.mubr.bf16.mxu0 %v941_v38  ;;  %1049 = vmatprep.mubr.bf16.mxu1 %v949_v39 }
 0x3c3   : > { %1018 = vmatmul.mubr.bf16.gmra.mrb[4].mxu0 %v940_v40  ;;  %1050 = vmatmul.mubr.bf16.gmra.mrb[4].mxu1 %v948_v41 }
 0x3c4   : > { %1025 = vmatprep.mubr.bf16.mxu0 %v943_v42  ;;  %1057 = vmatprep.mubr.bf16.mxu1 %v951_v43 }
 0x3cb   : > { %1026 = vmatmul.mubr.bf16.gmra.mrb[8].mxu0 %v942_v44  ;;  %1058 = vmatmul.mubr.bf16.gmra.mrb[8].mxu1 %v950_v45 }
 0x3cc   : > { %1033 = vmatprep.mubr.bf16.mxu0 %v945_v46  ;;  %1065 = vmatprep.mubr.bf16.mxu1 %v953_v47 }
 0x3d3   : > { %1034 = vmatmul.mubr.bf16.gmra.mrb[12].mxu0 %v944_v48  ;;  %1066 = vmatmul.mubr.bf16.gmra.mrb[12].mxu1 %v952_v49 }
 0x48e   : > { %v1381_v50 = vpop.f32.mrb[0].mxu0  ;;  %v1405_v51 = vpop.f32.mrb[0].mxu1 }
 0x48f   : > { %v1382_v53 = vpop.f32.mrb[1].mxu0  ;;  %v1406_v54 = vpop.f32.mrb[1].mxu1 }
 0x490   : > { %v1383_v55 = vadd.f32 %v1382_v53, %v1381_v50  ;;  %v1407_v56 = vadd.f32 %v1406_v54, %v1405_v51  ;;  %v1384_v57 = vpop.f32.mrb[2].mxu0  ;;  %v1408_v58 = vpop.f32.mrb[2].mxu1 }
 0x491   : > { %v1385_v59 = vpop.f32.mrb[3].mxu0  ;;  %v1409_v60 = vpop.f32.mrb[3].mxu1 }
 0x492   : > { %v1012_v61 = vadd.f32 %v1383_v55, %v2137_v52  ;;  %v1044_v62 = vadd.f32 %v1407_v56, %v2137_v52  ;;  %v1386_v63 = vadd.f32 %v1385_v59, %v1384_v57  ;;  %v1410_v17 = vadd.f32 %v1409_v60, %v1408_v58 }
 0x494   : > { %1074 = vst [vmem:[%s2033_s28] sm:$0xff] %v1012_v61  ;;  %1082 = vst [vmem:[%s2033_s28 + $0x40] sm:$0xff] %v1044_v62  ;;  %v1015_v0 = vadd.f32 %v1386_v63, %v2137_v52  ;;  %v1047_v1 = vadd.f32 %v1410_v17, %v2137_v52 }
 0x496   : > { %1075 = vst [vmem:[%s2033_s28 + $0x8] sm:$0xff] %v1015_v0  ;;  %1083 = vst [vmem:[%s2033_s28 + $0x48] sm:$0xff] %v1047_v1  ;;  %v1387_v2 = vpop.f32.mrb[4].mxu0  ;;  %v1411_v3 = vpop.f32.mrb[4].mxu1 }
 0x497   : > { %v1388_v4 = vpop.f32.mrb[5].mxu0  ;;  %v1412_v5 = vpop.f32.mrb[5].mxu1 }
 0x498   : > { %v1389_v6 = vadd.f32 %v1388_v4, %v1387_v2  ;;  %v1413_v7 = vadd.f32 %v1412_v5, %v1411_v3  ;;  %v1390_v8 = vpop.f32.mrb[6].mxu0  ;;  %v1414_v9 = vpop.f32.mrb[6].mxu1 }
 0x499   : > { %v1391_v10 = vpop.f32.mrb[7].mxu0  ;;  %v1415_v11 = vpop.f32.mrb[7].mxu1 }
 0x49a   : > { %v1020_v12 = vadd.f32 %v1389_v6, %v2137_v52  ;;  %v1052_v13 = vadd.f32 %v1413_v7, %v2137_v52  ;;  %v1392_v14 = vadd.f32 %v1391_v10, %v1390_v8  ;;  %v1416_v15 = vadd.f32 %v1415_v11, %v1414_v9 }
 0x49c   : > { %1076 = vst [vmem:[%s2033_s28 + $0x10] sm:$0xff] %v1020_v12  ;;  %1084 = vst [vmem:[%s2033_s28 + $0x50] sm:$0xff] %v1052_v13  ;;  %v1023_v16 = vadd.f32 %v1392_v14, %v2137_v52  ;;  %v1055_v18 = vadd.f32 %v1416_v15, %v2137_v52 }
 0x49e   : > { %1077 = vst [vmem:[%s2033_s28 + $0x18] sm:$0xff] %v1023_v16  ;;  %1085 = vst [vmem:[%s2033_s28 + $0x58] sm:$0xff] %v1055_v18  ;;  %v1393_v19 = vpop.f32.mrb[8].mxu0  ;;  %v1417_v20 = vpop.f32.mrb[8].mxu1 }
 0x49f   : > { %v1394_v21 = vpop.f32.mrb[9].mxu0  ;;  %v1418_v22 = vpop.f32.mrb[9].mxu1 }
 0x4a0   : > { %v1395_v23 = vadd.f32 %v1394_v21, %v1393_v19  ;;  %v1419_v24 = vadd.f32 %v1418_v22, %v1417_v20  ;;  %v1396_v25 = vpop.f32.mrb[10].mxu0  ;;  %v1420_v26 = vpop.f32.mrb[10].mxu1 }
 0x4a1   : > { %v1397_v27 = vpop.f32.mrb[11].mxu0  ;;  %v1421_v28 = vpop.f32.mrb[11].mxu1 }
 0x4a2   : > { %v1028_v29 = vadd.f32 %v1395_v23, %v2137_v52  ;;  %v1060_v30 = vadd.f32 %v1419_v24, %v2137_v52  ;;  %v1398_v31 = vadd.f32 %v1397_v27, %v1396_v25  ;;  %v1422_v32 = vadd.f32 %v1421_v28, %v1420_v26 }
 0x4a4   : > { %1078 = vst [vmem:[%s2033_s28 + $0x20] sm:$0xff] %v1028_v29  ;;  %1086 = vst [vmem:[%s2033_s28 + $0x60] sm:$0xff] %v1060_v30  ;;  %v1031_v33 = vadd.f32 %v1398_v31, %v2137_v52  ;;  %v1063_v34 = vadd.f32 %v1422_v32, %v2137_v52 }
 0x4a6   : > { %1079 = vst [vmem:[%s2033_s28 + $0x28] sm:$0xff] %v1031_v33  ;;  %1087 = vst [vmem:[%s2033_s28 + $0x68] sm:$0xff] %v1063_v34  ;;  %v1399_v35 = vpop.f32.mrb[12].mxu0  ;;  %v1423_v36 = vpop.f32.mrb[12].mxu1 }
 0x4a7   : > { %v1400_v37 = vpop.f32.mrb[13].mxu0  ;;  %v1424_v38 = vpop.f32.mrb[13].mxu1 }
 0x4a8   : > { %v1401_v39 = vadd.f32 %v1400_v37, %v1399_v35  ;;  %v1425_v40 = vadd.f32 %v1424_v38, %v1423_v36  ;;  %v1402_v41 = vpop.f32.mrb[14].mxu0  ;;  %v1426_v42 = vpop.f32.mrb[14].mxu1 }
 0x4a9   : > { %v1403_v43 = vpop.f32.mrb[15].mxu0  ;;  %v1427_v44 = vpop.f32.mrb[15].mxu1 }
 0x4aa   : > { %v1036_v45 = vadd.f32 %v1401_v39, %v2137_v52  ;;  %v1068_v46 = vadd.f32 %v1425_v40, %v2137_v52  ;;  %v1404_v47 = vadd.f32 %v1403_v43, %v1402_v41  ;;  %v1428_v48 = vadd.f32 %v1427_v44, %v1426_v42 }
 0x4ac   : > { %1080 = vst [vmem:[%s2033_s28 + $0x30] sm:$0xff] %v1036_v45  ;;  %1088 = vst [vmem:[%s2033_s28 + $0x70] sm:$0xff] %v1068_v46  ;;  %v1039_v49 = vadd.f32 %v1404_v47, %v2137_v52  ;;  %v1071_v50 = vadd.f32 %v1428_v48, %v2137_v52 }
 0x4ae   : > { %1081 = vst [vmem:[%s2033_s28 + $0x38] sm:$0xff] %v1039_v49  ;;  %1089 = vst [vmem:[%s2033_s28 + $0x78] sm:$0xff] %v1071_v50 }
 0x4af   : > { %1744 = shalt.err (!%p1741_p1)
}
 0x4b0   : > { %s1745_s12 = scalar_lea.hbm %s2170_s29, 2048  ;;  %s1749_s16 = scalar_lea.hbm %s2229_s6, 4096 }
 0x4b1   : > { %p1746_p3 = scmp.ne.s32.totalorder %s2170_s29, %s1745_s12  ;;  %p1750_p13 = scmp.lt.u32.totalorder %s2170_s29, %s2229_s6 }
 0x4b2   : > { %p1751_p4 = scmp.lt.u32.totalorder %s1749_s16, %s1745_s12  ;;  %p1753_p8 = scmp.lt.u32.totalorder %s1745_s12, %s2170_s29 }
 0x4b3   : > { %p1747_p5 = pnand %p1746_p3, %p2247_p12 }
 0x4b4   : > { %p1752_p7 = por %p1751_p4, %p1750_p13 }
 0x4b5   : > { %p1748_p11 = pneg %p1747_p5 }
 0x4b6   : > { %p1754_p0 = por %p1753_p8, %p1752_p7 }
 0x4b8   : > { %p1755_p2 = pnand %p1754_p0, %p1748_p11 }
 0x4ba   : > { %1758 = shalt.err (!%p1755_p2)
}
 0x4bb   : > { %s1835_s17 = smov 128   ;;  %s1836_s30 = smov 8  }
 0x4bc   : > { %1537 = dma.vmem_to_hbm [thread:$0]  (%p2247_p12), %s2172_s19, 2048, %s2170_s29, %s2182_s25, %s1835_s17, %s1835_s17, %s1836_s30  }
 0x4bd PF: > { %p1559_p6 = scmp.ge.s32.totalorder %s1811_s24, 2  ;;  %s1119_s18 = sand.u32 1, %s1799_s21  }
 0x4be   : > { %p2248_p9 = scmp.ne.s32.totalorder %s2237_s8, 0  ;;  %s1120_s20 = scalar_lea.sflag [#allocation8], %s1119_s18 }
 0x4c0   : > { %p1550_p10 = pnand %p1559_p6, %p2248_p9 }
 0x4c2   : > { %1794 = dma.done.wait (!%p1550_p10), %s1120_s20, 2048  }
 0x4c3   : > { %1796 = vsyncadd (!%p1550_p10), %s1120_s20, 4294965248  ;;  %s2249_s26 = sld [smem:[#allocation19_spill]]  ;;  %s2250_s23 = sld [smem:[#allocation20_spill]] }
 0x4c4   : > { %p18_p1 = scmp.ge.s32.totalorder %s1897_s27, 4   ;;  %s2251_s21 = smov %s1803_s22 }
 0x4c5   : > { %s2253_s24 = smov %s1897_s27 }
 0x4c6   :  { %20 = sbr.rel (!%p18_p1) target bundleno = 5 (0x5), region = 138 }
 0x4c9   : > { %s2252_s22 = smov %s2249_s26 }
 0x4cd   :  { %1125 = vsyncpa [#allocation7], 1 }
 0x4ce   :  { %1127 = vsyncpa [#allocation7 + $0x1], 1 }
 0x4cf   :  { %1128 = vsyncpa [#allocation10], 1 }
 0x4d0   :  { %1129 = vsyncpa [#allocation8], 1 }
 0x4d1   :  { %1131 = vsyncpa [#allocation8 + $0x1], 1 }
 0x4d2   :  { %1132 = vsyncmov [#allocation5] }
 0x4d5   :  { %s1133_s24 = vpop.sfrf %1132 }
 0x4d6   :  { %p1265_p12 = scmp.ne.s32.totalorder %s1133_s24, 0 }
 0x4d8   :  { %1137 = shalt.err (%p1265_p12)  }

</bundles_post_ra>
